<compile_context>
chip_gen: v7x
topology: tpu7x:2x2x1
jax: 0.10.0
libtpu: 0.0.40
codegen_flags: <defaults>
</compile_context>

<pallas_src>
import functools

import jax
import jax.numpy as jnp
from jax import lax
from jax.experimental import pallas as pl
from jax.experimental.pallas import tpu as pltpu

POWER_ITERATIONS = 1
EPS = 1e-12
assert POWER_ITERATIONS >= 1, "SpectralNorm power iteration must run at least once"

# dot_general dims: contract last dim of lhs with last dim of rhs ("N x N^T")
_NT_DIMS = (((1,), (1,)), ((), ()))


# ---------------------------------------------------------------------------
# Fused kernel: spectral-norm sigma (prologue) + conv matmul + bias (epilogue)
#   wflat_ref : (Cout, K)          flat weight, PyTorch view order (for sigma)
#   wk_ref    : (kh*kw, Cout, Cin) per-tap weight slabs (conv hot path)
#   u_ref     : (1, Cout)          weight_u buffer
#   b_ref     : (Cout, 1)          bias (column for broadcast over lanes)
#   x_ref     : (1, Cin, Lpad)     padded, spatially-flattened activation
#   o_ref     : (1, Cout, Lout)    lane-dense conv output (Lout multiple of 128)
#   unew_ref  : (1, 1, Cout)       updated weight_u
# ---------------------------------------------------------------------------
def _fused_sn_conv_kernel(wflat_ref, wk_ref, u_ref, b_ref, x_ref,
                          o_ref, unew_ref, *, kh, kw, wp, lout):
    f32 = jnp.float32
    w = wflat_ref[...].astype(f32)                                  # (Cout, K)
    u = u_ref[...].astype(f32)                                      # (1, Cout)

    # ---- power iteration + sigma (tiny matvecs, unrolled) ----
    v = None
    for _ in range(POWER_ITERATIONS):
        # v = l2normalize(W^T u)
        v = jnp.dot(u, w, preferred_element_type=f32)               # (1, K)
        v = v * pl.reciprocal(
            jnp.sqrt(jnp.sum(v * v, keepdims=True)) + EPS, approx=False)
        # u = l2normalize(W v)   (contract K with K: no transpose materialized)
        u = lax.dot_general(v, w, _NT_DIMS, preferred_element_type=f32)  # (1, Cout)
        u = u * pl.reciprocal(
            jnp.sqrt(jnp.sum(u * u, keepdims=True)) + EPS, approx=False)

    wv = lax.dot_general(v, w, _NT_DIMS, preferred_element_type=f32)     # (1, Cout)
    sigma = jnp.sum(u * wv, keepdims=True)                               # (1, 1)
    # exact reciprocal (approx=True -> EUP is fine at production tolerances)
    inv_sigma = pl.reciprocal(sigma, approx=False)

    unew_ref[0] = u.astype(unew_ref.dtype)                               # buffer update

    # ---- conv as kh*kw shifted matmuls (im2col folded into the kernel) ----
    x = x_ref[0].astype(f32)                                             # (Cin, Lpad)
    cout = w.shape[0]
    acc = jnp.zeros((cout, lout), f32)
    for idx in range(kh * kw):
        ki, kj = idx // kw, idx % kw
        shift = ki * wp + kj                    # static -> cheap lane-shifted slice
        xs = x[:, shift:shift + lout]                                    # (Cin, Lout)
        acc = acc + jnp.dot(wk_ref[idx].astype(f32), xs,
                            preferred_element_type=f32)
    # epilogue: spectral-norm scale + bias, single lane-dense store
    o_ref[0] = (acc * inv_sigma + b_ref[...].astype(f32)).astype(o_ref.dtype)


# ---------------------------------------------------------------------------
# Wrapper: SpectralNorm(Conv2d).forward
# ---------------------------------------------------------------------------
def spectral_norm_conv2d_forward(x, w_bar, u, bias, pad=1):
    """x: (N, Cin, H, W) NCHW; w_bar: (Cout, Cin, kh, kw); u: (Cout,); bias: (Cout,).
    Returns (out (N, Cout, H, W) NCHW, updated u (Cout,))."""
    N, Cin, H, W = x.shape
    Cout, _, kh, kw = w_bar.shape
    K = Cin * kh * kw
    Hp, Wp = H + 2 * pad, W + 2 * pad

    # lane-dense compute width (multiple of 128) covering all H*Wp output slots
    lout = max(128, ((H * Wp + 127) // 128) * 128)
    max_shift = (kh - 1) * Wp + (kw - 1)
    lpad = ((lout + max_shift + 127) // 128) * 128

    # Pad (halo) + flatten spatial; tail zeros keep every shifted slice in bounds.
    # TODO(synk): at production H,W move this halo staging into the kernel's
    # index_map / haloed DMA instead of an XLA pad pass.
    xp = jnp.pad(x, ((0, 0), (0, 0), (pad, pad), (pad, pad)))
    xflat = xp.reshape(N, Cin, Hp * Wp)
    xflat = jnp.pad(xflat, ((0, 0), (0, 0), (0, lpad - Hp * Wp)))

    w_flat = w_bar.reshape(Cout, K)                        # PyTorch w.view(h,-1) order
    w_k = jnp.transpose(w_bar, (2, 3, 0, 1)).reshape(kh * kw, Cout, Cin)
    u2d = u.reshape(1, Cout)
    b2d = bias.reshape(Cout, 1)

    kernel = functools.partial(_fused_sn_conv_kernel, kh=kh, kw=kw, wp=Wp, lout=lout)

    o, u_all = pl.pallas_call(
        kernel,
        out_shape=(jax.ShapeDtypeStruct((N, Cout, lout), x.dtype),
                   jax.ShapeDtypeStruct((N, 1, Cout), jnp.float32)),
        grid=(N,),
        in_specs=[
            pl.BlockSpec((Cout, K), lambda n: (0, 0)),
            pl.BlockSpec((kh * kw, Cout, Cin), lambda n: (0, 0, 0)),
            pl.BlockSpec((1, Cout), lambda n: (0, 0)),
            pl.BlockSpec((Cout, 1), lambda n: (0, 0)),
            pl.BlockSpec((1, Cin, lpad), lambda n: (n, 0, 0)),
        ],
        out_specs=(
            pl.BlockSpec((1, Cout, lout), lambda n: (n, 0, 0)),
            pl.BlockSpec((1, 1, Cout), lambda n: (n, 0, 0)),
        ),
        compiler_params=pltpu.CompilerParams(
            dimension_semantics=("parallel",)),
    )(w_flat, w_k, u2d, b2d, xflat)

    # Kernel output is already in (N, Cout, spatial) order -> NCHW with no transpose.
    out = o[:, :, :H * Wp].reshape(N, Cout, H, Wp)[:, :, :, :W]
    u_new = u_all[0, 0]
    return out, u_new


# ---------------------------------------------------------------------------
# Pure-JAX reference (mirrors PyTorch SpectralNorm semantics) for sanity check
# ---------------------------------------------------------------------------
def reference_forward(x, w_bar, u, bias, pad=1):
    Cout = w_bar.shape[0]
    w_mat = w_bar.reshape(Cout, -1)
    uu = u
    vv = None
    for _ in range(POWER_ITERATIONS):
        vv = w_mat.T @ uu
        vv = vv / (jnp.linalg.norm(vv) + EPS)
        uu = w_mat @ vv
        uu = uu / (jnp.linalg.norm(uu) + EPS)
    sigma = uu @ (w_mat @ vv)
    w_sn = w_bar / sigma
    out = lax.conv_general_dilated(x, w_sn, (1, 1), [(pad, pad), (pad, pad)],
                                   dimension_numbers=('NCHW', 'OIHW', 'NCHW'))
    return out + bias.reshape(1, -1, 1, 1), uu


if __name__ == "__main__":
    key = jax.random.PRNGKey(0)
    k_x, k_w, k_b, k_u = jax.random.split(key, 4)

    N, Cin, H, W = 2, 4, 16, 16
    Cout, kh, kw, pad = 8, 3, 3, 1

    x = jax.random.normal(k_x, (N, Cin, H, W), dtype=jnp.float32)
    w_bar = 0.1 * jax.random.normal(k_w, (Cout, Cin, kh, kw), dtype=jnp.float32)
    bias = 0.1 * jax.random.normal(k_b, (Cout,), dtype=jnp.float32)
    u = jax.random.normal(k_u, (Cout,), dtype=jnp.float32)
    u = u / (jnp.linalg.norm(u) + EPS)

    fwd = jax.jit(functools.partial(spectral_norm_conv2d_forward, pad=pad))
    out, u_new = fwd(x, w_bar, u, bias)
    out = jax.block_until_ready(out)
    u_new = jax.block_until_ready(u_new)

    ref_out, ref_u = reference_forward(x, w_bar, u, bias, pad=pad)
    assert out.shape == (N, Cout, H, W)
    assert jnp.allclose(out, ref_out, atol=1e-4, rtol=1e-4)
    assert jnp.allclose(u_new, ref_u, atol=1e-5, rtol=1e-5)

    print("KERNEL_OK")
</pallas_src>

<mosaic_0001>
module attributes {stable_mosaic.version = 11 : i64} {
  func.func @_fused_sn_conv_kernel(%arg0: i32, %arg1: memref<8x36xf32, #tpu.memory_space<vmem>>, %arg2: memref<9x8x4xf32, #tpu.memory_space<vmem>>, %arg3: memref<1x8xf32, #tpu.memory_space<vmem>>, %arg4: memref<8x1xf32, #tpu.memory_space<vmem>>, %arg5: memref<1x4x512xf32, #tpu.memory_space<vmem>>, %arg6: memref<1x8x384xf32, #tpu.memory_space<vmem>>, %arg7: memref<1x1x8xf32, #tpu.memory_space<vmem>>) attributes {dimension_semantics = [#tpu.dimension_semantics<parallel>], iteration_bounds = array<i64: 2>, scalar_prefetch = 0 : i64, scratch_operands = 0 : i64, tpu.core_type = #tpu.core_type<tc>, window_params = [{pipeline_mode = #tpu.pipeline_mode<synchronous>, transform_indices = @transform_0, window_bounds = array<i64: 8, 36>}, {pipeline_mode = #tpu.pipeline_mode<synchronous>, transform_indices = @transform_1, window_bounds = array<i64: 9, 8, 4>}, {pipeline_mode = #tpu.pipeline_mode<synchronous>, transform_indices = @transform_2, window_bounds = array<i64: 1, 8>}, {pipeline_mode = #tpu.pipeline_mode<synchronous>, transform_indices = @transform_3, window_bounds = array<i64: 8, 1>}, {transform_indices = @transform_4, window_bounds = array<i64: 1, 4, 512>}, {transform_indices = @transform_5, window_bounds = array<i64: 1, 8, 384>}, {transform_indices = @transform_6, window_bounds = array<i64: 1, 1, 8>}]} {
    %c0 = arith.constant 0 : index
    %c0_0 = arith.constant 0 : index
    %0 = vector.load %arg1[%c0, %c0_0] : memref<8x36xf32, #tpu.memory_space<vmem>>, vector<8x36xf32>
    %c0_1 = arith.constant 0 : index
    %c0_2 = arith.constant 0 : index
    %1 = vector.load %arg3[%c0_1, %c0_2] : memref<1x8xf32, #tpu.memory_space<vmem>>, vector<1x8xf32>
    %cst = arith.constant dense<0.000000e+00> : vector<1x36xf32>
    %2 = tpu.matmul %1, %0, %cst {dimension_numbers = #tpu.dot_dimension_numbers<[1], [0], [0], [1], [0, 0, 1, 1], [], []>} : vector<1x8xf32>, vector<8x36xf32>, vector<1x36xf32> -> vector<1x36xf32>
    %3 = arith.mulf %2, %2 : vector<1x36xf32>
    %4 = vector.shape_cast %3 : vector<1x36xf32> to vector<1x1x36xf32>
    %cst_3 = arith.constant dense<0.000000e+00> : vector<1xf32>
    %5 = vector.multi_reduction <add>, %4, %cst_3 [1, 2] : vector<1x1x36xf32> to vector<1xf32>
    %6 = vector.shape_cast %5 : vector<1xf32> to vector<1x1x1xf32>
    %7 = vector.extract %6[0, 0, 0] : f32 from vector<1x1x1xf32>
    %8 = vector.broadcast %7 : f32 to vector<1x1xf32>
    %9 = math.sqrt %8 : vector<1x1xf32>
    %cst_4 = arith.constant 9.99999996E-13 : f32
    %10 = vector.broadcast %cst_4 : f32 to vector<1x1xf32>
    %11 = arith.addf %9, %10 : vector<1x1xf32>
    %12 = tpu.reciprocal %11 : vector<1x1xf32> -> vector<1x1xf32>
    %13 = vector.broadcast %12 : vector<1x1xf32> to vector<1x36xf32>
    %14 = arith.mulf %2, %13 : vector<1x36xf32>
    %cst_5 = arith.constant dense<0.000000e+00> : vector<1x8xf32>
    %15 = tpu.matmul %14, %0, %cst_5 {dimension_numbers = #tpu.dot_dimension_numbers<[1], [1], [0], [0], [0, 0, 1, 0], [], []>} : vector<1x36xf32>, vector<8x36xf32>, vector<1x8xf32> -> vector<1x8xf32>
    %16 = arith.mulf %15, %15 : vector<1x8xf32>
    %17 = vector.shape_cast %16 : vector<1x8xf32> to vector<1x1x8xf32>
    %cst_6 = arith.constant dense<0.000000e+00> : vector<1xf32>
    %18 = vector.multi_reduction <add>, %17, %cst_6 [1, 2] : vector<1x1x8xf32> to vector<1xf32>
    %19 = vector.shape_cast %18 : vector<1xf32> to vector<1x1x1xf32>
    %20 = vector.extract %19[0, 0, 0] : f32 from vector<1x1x1xf32>
    %21 = vector.broadcast %20 : f32 to vector<1x1xf32>
    %22 = math.sqrt %21 : vector<1x1xf32>
    %cst_7 = arith.constant 9.99999996E-13 : f32
    %23 = vector.broadcast %cst_7 : f32 to vector<1x1xf32>
    %24 = arith.addf %22, %23 : vector<1x1xf32>
    %25 = tpu.reciprocal %24 : vector<1x1xf32> -> vector<1x1xf32>
    %26 = vector.broadcast %25 : vector<1x1xf32> to vector<1x8xf32>
    %27 = arith.mulf %15, %26 : vector<1x8xf32>
    %cst_8 = arith.constant dense<0.000000e+00> : vector<1x8xf32>
    %28 = tpu.matmul %14, %0, %cst_8 {dimension_numbers = #tpu.dot_dimension_numbers<[1], [1], [0], [0], [0, 0, 1, 0], [], []>} : vector<1x36xf32>, vector<8x36xf32>, vector<1x8xf32> -> vector<1x8xf32>
    %29 = arith.mulf %27, %28 : vector<1x8xf32>
    %30 = vector.shape_cast %29 : vector<1x8xf32> to vector<1x1x8xf32>
    %cst_9 = arith.constant dense<0.000000e+00> : vector<1xf32>
    %31 = vector.multi_reduction <add>, %30, %cst_9 [1, 2] : vector<1x1x8xf32> to vector<1xf32>
    %32 = vector.shape_cast %31 : vector<1xf32> to vector<1x1x1xf32>
    %33 = vector.extract %32[0, 0, 0] : f32 from vector<1x1x1xf32>
    %34 = vector.broadcast %33 : f32 to vector<1x1xf32>
    %35 = tpu.reciprocal %34 : vector<1x1xf32> -> vector<1x1xf32>
    %c0_10 = arith.constant 0 : index
    %c0_11 = arith.constant 0 : index
    %c0_12 = arith.constant 0 : index
    %36 = vector.load %arg7[%c0_10, %c0_11, %c0_12] : memref<1x1x8xf32, #tpu.memory_space<vmem>>, vector<1x1x8xf32>
    %37 = vector.shape_cast %36 : vector<1x1x8xf32> to vector<1x8xf32>
    %38 = vector.shape_cast %27 : vector<1x8xf32> to vector<1x1x8xf32>
    tpu.vector_store %arg7[%c0_10, %c0_11, %c0_12], %38 {strides = array<i32>} : memref<1x1x8xf32, #tpu.memory_space<vmem>>, vector<1x1x8xf32>,
    %c0_13 = arith.constant 0 : index
    %c0_14 = arith.constant 0 : index
    %c0_15 = arith.constant 0 : index
    %39 = vector.load %arg5[%c0_13, %c0_14, %c0_15] : memref<1x4x512xf32, #tpu.memory_space<vmem>>, vector<1x4x512xf32>
    %40 = vector.shape_cast %39 : vector<1x4x512xf32> to vector<4x512xf32>
    %cst_16 = arith.constant 0.000000e+00 : f32
    %41 = vector.broadcast %cst_16 : f32 to vector<8x384xf32>
    %42 = vector.extract_strided_slice %40 {offsets = [0, 0], sizes = [4, 384], strides = [1, 1]} : vector<4x512xf32> to vector<4x384xf32>
    %c0_17 = arith.constant 0 : index
    %c0_18 = arith.constant 0 : index
    %c0_19 = arith.constant 0 : index
    %43 = vector.load %arg2[%c0_17, %c0_18, %c0_19] : memref<9x8x4xf32, #tpu.memory_space<vmem>>, vector<1x8x4xf32>
    %44 = vector.shape_cast %43 : vector<1x8x4xf32> to vector<8x4xf32>
    %cst_20 = arith.constant dense<0.000000e+00> : vector<8x384xf32>
    %45 = tpu.matmul %44, %42, %cst_20 {dimension_numbers = #tpu.dot_dimension_numbers<[1], [0], [0], [1], [0, 0, 1, 1], [], []>} : vector<8x4xf32>, vector<4x384xf32>, vector<8x384xf32> -> vector<8x384xf32>
    %46 = arith.addf %41, %45 : vector<8x384xf32>
    %47 = vector.extract_strided_slice %40 {offsets = [0, 1], sizes = [4, 384], strides = [1, 1]} : vector<4x512xf32> to vector<4x384xf32>
    %c1 = arith.constant 1 : index
    %c0_21 = arith.constant 0 : index
    %c0_22 = arith.constant 0 : index
    %48 = vector.load %arg2[%c1, %c0_21, %c0_22] : memref<9x8x4xf32, #tpu.memory_space<vmem>>, vector<1x8x4xf32>
    %49 = vector.shape_cast %48 : vector<1x8x4xf32> to vector<8x4xf32>
    %cst_23 = arith.constant dense<0.000000e+00> : vector<8x384xf32>
    %50 = tpu.matmul %49, %47, %cst_23 {dimension_numbers = #tpu.dot_dimension_numbers<[1], [0], [0], [1], [0, 0, 1, 1], [], []>} : vector<8x4xf32>, vector<4x384xf32>, vector<8x384xf32> -> vector<8x384xf32>
    %51 = arith.addf %46, %50 : vector<8x384xf32>
    %52 = vector.extract_strided_slice %40 {offsets = [0, 2], sizes = [4, 384], strides = [1, 1]} : vector<4x512xf32> to vector<4x384xf32>
    %c2 = arith.constant 2 : index
    %c0_24 = arith.constant 0 : index
    %c0_25 = arith.constant 0 : index
    %53 = vector.load %arg2[%c2, %c0_24, %c0_25] : memref<9x8x4xf32, #tpu.memory_space<vmem>>, vector<1x8x4xf32>
    %54 = vector.shape_cast %53 : vector<1x8x4xf32> to vector<8x4xf32>
    %cst_26 = arith.constant dense<0.000000e+00> : vector<8x384xf32>
    %55 = tpu.matmul %54, %52, %cst_26 {dimension_numbers = #tpu.dot_dimension_numbers<[1], [0], [0], [1], [0, 0, 1, 1], [], []>} : vector<8x4xf32>, vector<4x384xf32>, vector<8x384xf32> -> vector<8x384xf32>
    %56 = arith.addf %51, %55 : vector<8x384xf32>
    %57 = vector.extract_strided_slice %40 {offsets = [0, 18], sizes = [4, 384], strides = [1, 1]} : vector<4x512xf32> to vector<4x384xf32>
    %c3 = arith.constant 3 : index
    %c0_27 = arith.constant 0 : index
    %c0_28 = arith.constant 0 : index
    %58 = vector.load %arg2[%c3, %c0_27, %c0_28] : memref<9x8x4xf32, #tpu.memory_space<vmem>>, vector<1x8x4xf32>
    %59 = vector.shape_cast %58 : vector<1x8x4xf32> to vector<8x4xf32>
    %cst_29 = arith.constant dense<0.000000e+00> : vector<8x384xf32>
    %60 = tpu.matmul %59, %57, %cst_29 {dimension_numbers = #tpu.dot_dimension_numbers<[1], [0], [0], [1], [0, 0, 1, 1], [], []>} : vector<8x4xf32>, vector<4x384xf32>, vector<8x384xf32> -> vector<8x384xf32>
    %61 = arith.addf %56, %60 : vector<8x384xf32>
    %62 = vector.extract_strided_slice %40 {offsets = [0, 19], sizes = [4, 384], strides = [1, 1]} : vector<4x512xf32> to vector<4x384xf32>
    %c4 = arith.constant 4 : index
    %c0_30 = arith.constant 0 : index
    %c0_31 = arith.constant 0 : index
    %63 = vector.load %arg2[%c4, %c0_30, %c0_31] : memref<9x8x4xf32, #tpu.memory_space<vmem>>, vector<1x8x4xf32>
    %64 = vector.shape_cast %63 : vector<1x8x4xf32> to vector<8x4xf32>
    %cst_32 = arith.constant dense<0.000000e+00> : vector<8x384xf32>
    %65 = tpu.matmul %64, %62, %cst_32 {dimension_numbers = #tpu.dot_dimension_numbers<[1], [0], [0], [1], [0, 0, 1, 1], [], []>} : vector<8x4xf32>, vector<4x384xf32>, vector<8x384xf32> -> vector<8x384xf32>
    %66 = arith.addf %61, %65 : vector<8x384xf32>
    %67 = vector.extract_strided_slice %40 {offsets = [0, 20], sizes = [4, 384], strides = [1, 1]} : vector<4x512xf32> to vector<4x384xf32>
    %c5 = arith.constant 5 : index
    %c0_33 = arith.constant 0 : index
    %c0_34 = arith.constant 0 : index
    %68 = vector.load %arg2[%c5, %c0_33, %c0_34] : memref<9x8x4xf32, #tpu.memory_space<vmem>>, vector<1x8x4xf32>
    %69 = vector.shape_cast %68 : vector<1x8x4xf32> to vector<8x4xf32>
    %cst_35 = arith.constant dense<0.000000e+00> : vector<8x384xf32>
    %70 = tpu.matmul %69, %67, %cst_35 {dimension_numbers = #tpu.dot_dimension_numbers<[1], [0], [0], [1], [0, 0, 1, 1], [], []>} : vector<8x4xf32>, vector<4x384xf32>, vector<8x384xf32> -> vector<8x384xf32>
    %71 = arith.addf %66, %70 : vector<8x384xf32>
    %72 = vector.extract_strided_slice %40 {offsets = [0, 36], sizes = [4, 384], strides = [1, 1]} : vector<4x512xf32> to vector<4x384xf32>
    %c6 = arith.constant 6 : index
    %c0_36 = arith.constant 0 : index
    %c0_37 = arith.constant 0 : index
    %73 = vector.load %arg2[%c6, %c0_36, %c0_37] : memref<9x8x4xf32, #tpu.memory_space<vmem>>, vector<1x8x4xf32>
    %74 = vector.shape_cast %73 : vector<1x8x4xf32> to vector<8x4xf32>
    %cst_38 = arith.constant dense<0.000000e+00> : vector<8x384xf32>
    %75 = tpu.matmul %74, %72, %cst_38 {dimension_numbers = #tpu.dot_dimension_numbers<[1], [0], [0], [1], [0, 0, 1, 1], [], []>} : vector<8x4xf32>, vector<4x384xf32>, vector<8x384xf32> -> vector<8x384xf32>
    %76 = arith.addf %71, %75 : vector<8x384xf32>
    %77 = vector.extract_strided_slice %40 {offsets = [0, 37], sizes = [4, 384], strides = [1, 1]} : vector<4x512xf32> to vector<4x384xf32>
    %c7 = arith.constant 7 : index
    %c0_39 = arith.constant 0 : index
    %c0_40 = arith.constant 0 : index
    %78 = vector.load %arg2[%c7, %c0_39, %c0_40] : memref<9x8x4xf32, #tpu.memory_space<vmem>>, vector<1x8x4xf32>
    %79 = vector.shape_cast %78 : vector<1x8x4xf32> to vector<8x4xf32>
    %cst_41 = arith.constant dense<0.000000e+00> : vector<8x384xf32>
    %80 = tpu.matmul %79, %77, %cst_41 {dimension_numbers = #tpu.dot_dimension_numbers<[1], [0], [0], [1], [0, 0, 1, 1], [], []>} : vector<8x4xf32>, vector<4x384xf32>, vector<8x384xf32> -> vector<8x384xf32>
    %81 = arith.addf %76, %80 : vector<8x384xf32>
    %82 = vector.extract_strided_slice %40 {offsets = [0, 38], sizes = [4, 384], strides = [1, 1]} : vector<4x512xf32> to vector<4x384xf32>
    %c8 = arith.constant 8 : index
    %c0_42 = arith.constant 0 : index
    %c0_43 = arith.constant 0 : index
    %83 = vector.load %arg2[%c8, %c0_42, %c0_43] : memref<9x8x4xf32, #tpu.memory_space<vmem>>, vector<1x8x4xf32>
    %84 = vector.shape_cast %83 : vector<1x8x4xf32> to vector<8x4xf32>
    %cst_44 = arith.constant dense<0.000000e+00> : vector<8x384xf32>
    %85 = tpu.matmul %84, %82, %cst_44 {dimension_numbers = #tpu.dot_dimension_numbers<[1], [0], [0], [1], [0, 0, 1, 1], [], []>} : vector<8x4xf32>, vector<4x384xf32>, vector<8x384xf32> -> vector<8x384xf32>
    %86 = arith.addf %81, %85 : vector<8x384xf32>
    %87 = vector.broadcast %35 : vector<1x1xf32> to vector<8x384xf32>
    %88 = arith.mulf %86, %87 : vector<8x384xf32>
    %c0_45 = arith.constant 0 : index
    %c0_46 = arith.constant 0 : index
    %89 = vector.load %arg4[%c0_45, %c0_46] : memref<8x1xf32, #tpu.memory_space<vmem>>, vector<8x1xf32>
    %90 = vector.broadcast %89 : vector<8x1xf32> to vector<8x384xf32>
    %91 = arith.addf %88, %90 : vector<8x384xf32>
    %c0_47 = arith.constant 0 : index
    %c0_48 = arith.constant 0 : index
    %c0_49 = arith.constant 0 : index
    %92 = vector.load %arg6[%c0_47, %c0_48, %c0_49] : memref<1x8x384xf32, #tpu.memory_space<vmem>>, vector<1x8x384xf32>
    %93 = vector.shape_cast %92 : vector<1x8x384xf32> to vector<8x384xf32>
    %94 = vector.shape_cast %91 : vector<8x384xf32> to vector<1x8x384xf32>
    tpu.vector_store %arg6[%c0_47, %c0_48, %c0_49], %94 {strides = array<i32>} : memref<1x8x384xf32, #tpu.memory_space<vmem>>, vector<1x8x384xf32>,
    return
  }
  func.func @transform_0(%arg0: i32) -> (i32, i32) {
    %c0_i32 = arith.constant 0 : i32
    %c0_i32_0 = arith.constant 0 : i32
    %c0_i32_1 = arith.constant 0 : i32
    return %c0_i32, %c0_i32_0 : i32, i32
  }
  func.func @transform_1(%arg0: i32) -> (i32, i32, i32) {
    %c0_i32 = arith.constant 0 : i32
    %c0_i32_0 = arith.constant 0 : i32
    %c0_i32_1 = arith.constant 0 : i32
    %c0_i32_2 = arith.constant 0 : i32
    return %c0_i32, %c0_i32_0, %c0_i32_1 : i32, i32, i32
  }
  func.func @transform_2(%arg0: i32) -> (i32, i32) {
    %c0_i32 = arith.constant 0 : i32
    %c0_i32_0 = arith.constant 0 : i32
    %c0_i32_1 = arith.constant 0 : i32
    return %c0_i32, %c0_i32_0 : i32, i32
  }
  func.func @transform_3(%arg0: i32) -> (i32, i32) {
    %c0_i32 = arith.constant 0 : i32
    %c0_i32_0 = arith.constant 0 : i32
    %c0_i32_1 = arith.constant 0 : i32
    return %c0_i32, %c0_i32_0 : i32, i32
  }
  func.func @transform_4(%arg0: i32) -> (i32, i32, i32) {
    %c0_i32 = arith.constant 0 : i32
    %c0_i32_0 = arith.constant 0 : i32
    %c0_i32_1 = arith.constant 0 : i32
    return %arg0, %c0_i32, %c0_i32_0 : i32, i32, i32
  }
  func.func @transform_5(%arg0: i32) -> (i32, i32, i32) {
    %c0_i32 = arith.constant 0 : i32
    %c0_i32_0 = arith.constant 0 : i32
    %c0_i32_1 = arith.constant 0 : i32
    return %arg0, %c0_i32, %c0_i32_0 : i32, i32, i32
  }
  func.func @transform_6(%arg0: i32) -> (i32, i32, i32) {
    %c0_i32 = arith.constant 0 : i32
    %c0_i32_0 = arith.constant 0 : i32
    %c0_i32_1 = arith.constant 0 : i32
    return %arg0, %c0_i32, %c0_i32_0 : i32, i32, i32
  }
}

</mosaic_0001>

<bundles_post_ra>
// kernel: spectral_norm_conv2d_forward.1
= control target key start
LH: loop header
LB: loop body
LE: loop exit
PB: predicated region body
PF: predicated region fallthrough
CT: control target
= control target key end

     0   :  { %s2331_s21 = smov 0   ;;  %s2568_s0 = inlined_call_operand.vmem [shape: f32[8,36], index: 0, kind: input, shape index: {}]   ;;  %s2569_s1 = inlined_call_operand.vmem [shape: f32[9,8,4], index: 1, kind: input, shape index: {}]   ;;  %s2570_s2 = inlined_call_operand.vmem [shape: f32[1,8], index: 2, kind: input, shape index: {}]   ;;  %s2571_s3 = inlined_call_operand.vmem [shape: f32[8,1], index: 3, kind: input, shape index: {}]   ;;  %s2572_s4 = inlined_call_operand.vmem [shape: f32[2,4,512], index: 4, kind: input, shape index: {}]   ;;  %s2573_s5 = inlined_call_operand.vmem [shape: f32[2,8,384], index: 5, kind: output, shape index: {0}]   ;;  %s2574_s6 = inlined_call_operand.vmem [shape: f32[2,1,8], index: 6, kind: output, shape index: {1}]  }
   0x1 LB: > { %s2061_s22 = sadd.s32 4294967295, %s2283_s21   ;;  %p2065_p0 = scmp.ge.s32.totalorder %s2283_s21, 1  ;;  %s2283_s21 = sphi %s2331_s21, %s17_s21  }
   0x2   : > { %p215_p1 = scmp.lt.s32.totalorder %s2283_s21, 3 }
   0x4   : > { %p216_p2 = pnand %p2065_p0, %p215_p1 }
   0x5   : > { %v261_v0 = vld [vmem:[%s2568_s0] sm:$0xff] (!%p216_p2)  ;;  %vm263_vm0 = vcmask (!%p216_p2), 64512   ;;  %v2285_v2 = vmov (!%p216_p2), 0.0   ;;  %vm2286_vm1 = vmmov (!%p216_p2), 0   ;;  %vm338_vm2 = vcmask (!%p216_p2), 286720   ;;  %p248_p3 = scmp.lt.s32.totalorder (!%p216_p2), %s2061_s22, 1 }
   0x6   : > { %219 = sbr.rel (%p216_p2) target bundleno = 1133 (0x46d), region = 40  ;;  %v262_v1 = vld [vmem:[%s2570_s2] sm:$0x1] (!%p216_p2)  ;;  %2150 = vmatprep.subr.mxu0 (!%p216_p2), %v2285_v2  ;;  %2152 = vmatprep.mubr.msk.f32.mxu0 (!%p216_p2), %vm2286_vm1, %v2285_v2  ;;  %vm360_vm3 = vcmask (!%p216_p2), 293888   ;;  %s2287_s7 = smov (!%p216_p2), 127   ;;  %vm491_vm6 = vcmask (!%p216_p2), 1039360  }
   0x7   : > { %2151 = vmatpush3.msra.mxu0 (!%p216_p2), %v261_v0  ;;  %2155 = vmatprep.subr.mxu1 (!%p216_p2), %v2285_v2  ;;  %s2288_s8 = smov (!%p216_p2), 108   ;;  %s2289_s9 = smov (!%p216_p2), 92   ;;  %vm499_vm7 = vcmask (!%p216_p2), 1043456   ;;  %v2072_v31 = vld [vmem:[%s2569_s1 + $0x8] sm:$0xff] (!%p216_p2)  ;;  %vm495_vm8 = vcmask (!%p216_p2), 31744   ;;  %vm807_vm9 = vcmask (!%p216_p2), 1031168  }
   0x8   : > { %2153 = vmatmul.mubr.msk.f32.vlgmr.msra.gmra.mrb[0].mxu0 (!%p216_p2), %vm263_vm0, %v262_v1  ;;  %2157 = vmatprep.mubr.msk.f32.mxu1 (!%p216_p2), %vm2286_vm1, %v2285_v2  ;;  %s2290_s10 = smov (!%p216_p2), 126   ;;  %s2291_s11 = smov (!%p216_p2), 110   ;;  %v476_v41 = vld [vmem:[%s2569_s1] sm:$0xff] (!%p216_p2)  ;;  %vm974_vm10 = vcmask (!%p216_p2), 900096   ;;  %v2083_v46 = vld [vmem:[%s2569_s1 + $0x10] sm:$0xff] (!%p216_p2)  ;;  %v2089_v50 = vld [vmem:[%s2569_s1 + $0x18] sm:$0xff] (!%p216_p2) }
   0x9   : > { %570 = vmatprep.mubr.f32.mxu0 (!%p216_p2), %v2285_v2  ;;  %2156 = vmatpush3.xpose.msk.msra.mxu1 (!%p216_p2), %vm360_vm3, %v261_v0  ;;  %s2292_s12 = smov (!%p216_p2), 109   ;;  %s2293_s14 = smov (!%p216_p2), 91   ;;  %vm1141_vm11 = vcmask (!%p216_p2), 891904   ;;  %v2095_v56 = vld [vmem:[%s2569_s1 + $0x20] sm:$0xff] (!%p216_p2)  ;;  %vm1308_vm12 = vcmask (!%p216_p2), 883712   ;;  %v2101_v0 = vld [vmem:[%s2569_s1 + $0x28] sm:$0xff] (!%p216_p2) }
   0xa   : > { %2160 = vmatprep.subr.mxu1 (!%p216_p2), %v2285_v2  ;;  %s2294_s19 = smov (!%p216_p2), 90   ;;  %vm1475_vm13 = vcmask (!%p216_p2), 752640   ;;  %vm438_vm14 = vcmask (!%p216_p2), 57344   ;;  %vm1642_vm15 = vcmask (!%p216_p2), 744448   ;;  %vm1809_vm0 = vcmask (!%p216_p2), 736256  }
   0xd   : > { %s2576_s22 = smov (!%p248_p3, %s2061_s22), 1 }
   0xe   : > { %s2127_s27 = sshll.u32 %s2576_s22, 4  ;;  %s260_s17 = scalar_lea.vmem %s2574_s6, %s2576_s22 }
   0xf   : > { %s252_s30 = scalar_lea.vmem %s2572_s4, %s2127_s27 }
  0x10   : > { %v2364_v7 = vld [vmem:[%s252_s30 + $0x8] sm:$0xff]  ;;  %v2366_v8 = vld [vmem:[%s252_s30] sm:$0xff] }
  0x11   : > { %487 = vrot.lane.b32.xlu1 %v2364_v7, %s2287_s7  ;;  %v2371_v9 = vcombine.high %v2366_v8, %v2366_v8  ;;  %v2377_v10 = vcombine.high %v2364_v7, %v2364_v7 }
  0x15   : > { %483 = vrot.lane.b32.xlu1 %v2366_v8, %s2287_s7 }
  0x19   : > { %489 = vrot.lane.b32.xlu1 %v2377_v10, %s2287_s7 }
  0x1d   : > { %801 = vrot.lane.b32.xlu1 %v2371_v9, %s2290_s10 }
  0x21   : > { %803 = vrot.lane.b32.xlu1 %v2364_v7, %s2290_s10 }
  0x25   : > { %799 = vrot.lane.b32.xlu1 %v2366_v8, %s2290_s10 }
  0x29   : > { %805 = vrot.lane.b32.xlu1 %v2377_v10, %s2290_s10 }
  0x2d   : > { %968 = vrot.lane.b32.xlu1 %v2371_v9, %s2291_s11 }
  0x31   : > { %970 = vrot.lane.b32.xlu1 %v2364_v7, %s2291_s11 }
  0x35   : > { %966 = vrot.lane.b32.xlu1 %v2366_v8, %s2291_s11 }
  0x39   : > { %972 = vrot.lane.b32.xlu1 %v2377_v10, %s2291_s11 }
  0x3d   : > { %1135 = vrot.lane.b32.xlu1 %v2371_v9, %s2292_s12 }
  0x41   : > { %1137 = vrot.lane.b32.xlu1 %v2364_v7, %s2292_s12 }
  0x45   : > { %1133 = vrot.lane.b32.xlu1 %v2366_v8, %s2292_s12 }
  0x49   : > { %1139 = vrot.lane.b32.xlu1 %v2377_v10, %s2292_s12 }
  0x4d   : > { %1304 = vrot.lane.b32.xlu1 %v2364_v7, %s2288_s8 }
  0x51   : > { %1300 = vrot.lane.b32.xlu1 %v2366_v8, %s2288_s8 }
  0x55   : > { %1306 = vrot.lane.b32.xlu1 %v2377_v10, %s2288_s8 }
  0x59   : > { %1469 = vrot.lane.b32.xlu1 %v2371_v9, %s2289_s9 }
  0x5d   : > { %1471 = vrot.lane.b32.xlu1 %v2364_v7, %s2289_s9 }
  0x61   : > { %1473 = vrot.lane.b32.xlu1 %v2377_v10, %s2289_s9 }
  0x65   : > { %1638 = vrot.lane.b32.xlu1 %v2364_v7, %s2293_s14 }
  0x69   : > { %1640 = vrot.lane.b32.xlu1 %v2377_v10, %s2293_s14 }
  0x6d   : > { %1805 = vrot.lane.b32.xlu1 %v2364_v7, %s2294_s19 }
  0x71   : > { %1807 = vrot.lane.b32.xlu1 %v2377_v10, %s2294_s19 }
  0x83   : > { %v488_v27 = vpop.permute.xlu1 %487 }
  0x87   : > { %v484_v30 = vpop.permute.xlu1 %483 }
  0x8b   : > { %v490_v33 = vpop.permute.xlu1 %489 }
  0x8c   : > { %v494_v34 = vsel %vm491_vm6, %v488_v27, %v490_v33 }
  0x8f   : > { %v802_v35 = vpop.permute.xlu1 %801 }
  0x93   : > { %v804_v36 = vpop.permute.xlu1 %803 }
  0x94   : > { %v809_v37 = vsel %vm807_vm9, %v802_v35, %v804_v36 }
  0x97   : > { %v800_v38 = vpop.permute.xlu1 %799 }
  0x98   : > { %v808_v40 = vsel %vm807_vm9, %v800_v38, %v802_v35 }
  0x9b   : > { %v806_v39 = vpop.permute.xlu1 %805 }
  0x9c   : > { %v810_v42 = vsel %vm807_vm9, %v804_v36, %v806_v39 }
  0x9f   : > { %v969_v43 = vpop.permute.xlu1 %968 }
  0xa3   : > { %v971_v44 = vpop.permute.xlu1 %970 }
  0xa4   : > { %v976_v45 = vsel %vm974_vm10, %v969_v43, %v971_v44 }
  0xa7   : > { %v967_v47 = vpop.permute.xlu1 %966 }
  0xa8   : > { %v975_v48 = vsel %vm974_vm10, %v967_v47, %v969_v43 }
  0xab   : > { %v973_v49 = vpop.permute.xlu1 %972 }
  0xac   : > { %v977_v51 = vsel %vm974_vm10, %v971_v44, %v973_v49 }
  0xaf   : > { %v1136_v52 = vpop.permute.xlu1 %1135 }
  0xb3   : > { %v1138_v53 = vpop.permute.xlu1 %1137 }
  0xb4   : > { %v1143_v54 = vsel %vm1141_vm11, %v1136_v52, %v1138_v53 }
  0xb7   : > { %v1134_v55 = vpop.permute.xlu1 %1133 }
  0xb8   : > { %v1142_v57 = vsel %vm1141_vm11, %v1134_v55, %v1136_v52 }
  0xbb   : > { %v1140_v58 = vpop.permute.xlu1 %1139 }
  0xbc   : > { %v1144_v59 = vsel %vm1141_vm11, %v1138_v53, %v1140_v58 }
  0xbf   : > { %v1305_v61 = vpop.permute.xlu1 %1304 }
  0xc3   : > { %v1301_v63 = vpop.permute.xlu1 %1300 }
  0xdb   : > { %v2352_v3 = vpop.f32.mrb[0].mxu0 }
  0xdc   : > { %v2154_v4 = vpop.f32.mrb[1].mxu0  ;;  %v337_v5 = vmul.f32 %v2352_v3, %v2352_v3 }
  0xde   : > { %v339_v6 = vsel %vm338_vm2, %v337_v5, 0.0 }
  0xdf   : > { %340 = vadd.xlane.f32.xlu0 %v339_v6 }
  0xf5   : > { %485 = vrot.lane.b32.xlu0 %v2371_v9, %s2287_s7 }
  0xf9   : > { %1302 = vrot.lane.b32.xlu0 %v2371_v9, %s2288_s8 }
  0xfd   : > { %1467 = vrot.lane.b32.xlu0 %v2366_v8, %s2289_s9 }
 0x16c   : > { %v341_v11 = vpop.xlane.xlu0 %340 }
 0x16d   : > { %v342_v12 = vrot.slane %v341_v11, 4 }
 0x16f   : > { %v343_v13 = vadd.f32 %v342_v12, %v341_v11 }
 0x170   : > { %v486_v28 = vpop.permute.xlu0 %485 }
 0x171   : > { %v344_v14 = vrot.slane %v343_v13, 2  ;;  %v493_v29 = vsel %vm491_vm6, %v486_v28, %v488_v27  ;;  %v492_v32 = vsel %vm491_vm6, %v484_v30, %v486_v28 }
 0x172   : > { %2073 = vmatprep.subr.msk.mxu0 %vm499_vm7, %v493_v29 }
 0x173   : > { %v345_v15 = vadd.f32 %v344_v14, %v343_v13  ;;  %2074 = vmatpush1.msk.msra.mxu0 %vm499_vm7, %v492_v32 }
 0x174   : > { %2075 = vmatmul.mubr.msk.f32.vlgmr.msra.gmra.mrb[2].mxu0 %vm495_vm8, %v2072_v31  ;;  %2078 = vmatprep.subr.msk.mxu0 %vm499_vm7, %v2371_v9  ;;  %v1303_v60 = vpop.permute.xlu0 %1302 }
 0x175   : > { %v346_v16 = vrot.slane %v345_v15, 1  ;;  %2079 = vmatpush1.msk.msra.mxu0 %vm499_vm7, %v2366_v8  ;;  %720 = vmatprep.mubr.f32.mxu0 %v2285_v2  ;;  %v1310_v62 = vsel %vm1308_vm12, %v1303_v60, %v1305_v61  ;;  %v1309_v1 = vsel %vm1308_vm12, %v1301_v63, %v1303_v60 }
 0x176   : > { %2084 = vmatprep.subr.msk.mxu0 %vm499_vm7, %v809_v37 }
 0x177   : > { %v347_v17 = vadd.f32 %v346_v16, %v345_v15 }
 0x178   : > { %v1468_v6 = vpop.permute.xlu0 %1467 }
 0x179   : > { %2238 = vpush %v347_v17  ;;  %v2107_v17 = vld [vmem:[%s2569_s1 + $0x30] sm:$0xff] }
 0x17c   : > { %2080 = vmatmul.mubr.msk.f32.vlgmr.msra.gmra.mrb[2].mxu0 %vm495_vm8, %v476_v41 }
 0x17d   : > { %2085 = vmatpush1.msk.msra.mxu0 %vm499_vm7, %v808_v40  ;;  %884 = vmatprep.mubr.f32.mxu0 %v2285_v2 }
 0x17e   : > { %2090 = vmatprep.subr.msk.mxu0 %vm499_vm7, %v976_v45 }
 0x184   : > { %2086 = vmatmul.mubr.msk.f32.vlgmr.msra.gmra.mrb[2].mxu0 %vm495_vm8, %v2083_v46 }
 0x185   : > { %1051 = vmatprep.mubr.f32.mxu0 %v2285_v2  ;;  %2091 = vmatpush1.msk.msra.mxu0 %vm499_vm7, %v975_v48 }
 0x186   : > { %2096 = vmatprep.subr.msk.mxu0 %vm499_vm7, %v1143_v54 }
 0x18c   : > { %2092 = vmatmul.mubr.msk.f32.vlgmr.msra.gmra.mrb[2].mxu0 %vm495_vm8, %v2089_v50 }
 0x18d   : > { %1218 = vmatprep.mubr.f32.mxu0 %v2285_v2  ;;  %2097 = vmatpush1.msk.msra.mxu0 %vm499_vm7, %v1142_v57 }
 0x18e   : > { %2102 = vmatprep.subr.msk.mxu0 %vm499_vm7, %v1310_v62 }
 0x194   : > { %2098 = vmatmul.mubr.msk.f32.vlgmr.msra.gmra.mrb[2].mxu0 %vm495_vm8, %v2095_v56 }
 0x195   : > { %1385 = vmatprep.mubr.f32.mxu0 %v2285_v2  ;;  %2103 = vmatpush1.msk.msra.mxu0 %vm499_vm7, %v1309_v1 }
 0x19c   : > { %2104 = vmatmul.mubr.msk.f32.vlgmr.msra.gmra.mrb[2].mxu0 %vm495_vm8, %v2101_v0 }
 0x19d   : > { %1552 = vmatprep.mubr.f32.mxu0 %v2285_v2 }
 0x1aa   : > { %s2239_s13 = spop %2238 }
 0x1ab   : > { %v349_v18 = vstv %s2239_s13 }
 0x1ac   : > { %2267 = vrsqrt.f32 %v349_v18  ;;  %vm352_vm4 = vcmp.eq.f32.partialorder %v349_v18, inf  ;;  %v355_v21 = vand.u32 2147483648, %v349_v18  ;;  %vm354_vm5 = vcmp.eq.f32.partialorder %v349_v18, 0.0 }
 0x1b6   : > { %v2268_v19 = vpop.eup %2267 }
 0x1b7   : > { %v351_v20 = vmul.f32 %v2268_v19, %v349_v18 }
 0x1b9   : > { %v353_v22 = vsel %vm352_vm4, %v349_v18, %v351_v20 }
 0x1ba   : > { %v356_v23 = vsel %vm354_vm5, %v355_v21, %v353_v22  ;;  %v2113_v21 = vld [vmem:[%s2569_s1 + $0x38] sm:$0xff] }
 0x1bb   : > { %v357_v24 = vadd.f32 1e-12, %v356_v23  ;;  %v2119_v23 = vld [vmem:[%s2569_s1 + $0x40] sm:$0xff] }
 0x1bd   : > { %2269 = vrcp.f32 %v357_v24 }
 0x1c7   : > { %v2270_v25 = vpop.eup %2269 }
 0x1c8   : > { %v359_v26 = vmul.f32 %v2270_v25, %v2352_v3  ;;  %v1307_v3 = vpop.permute.xlu1 %1306  ;;  %v1969_v25 = vld [vmem:[%s2571_s3] sm:$0xff] }
 0x1c9   : > { %v1311_v4 = vsel %vm1308_vm12, %v1305_v61, %v1307_v3 }
 0x1ca   : > { %2158 = vmatmul.mubr.msk.f32.vlgmr.msra.gmra.mrb[0].mxu1 %vm360_vm3, %v359_v26  ;;  %v2295_v26 = vmov 0  }
 0x1cb   : > { %2162 = vmatprep.mubr.msk.f32.mxu1 %vm2286_vm1, %v2285_v2  ;;  %2161 = vmatpush3.msk.msra.mxu1 %vm499_vm7, %v494_v34 }
 0x1cc   : > { %2165 = vmatprep.subr.mxu1 %v2285_v2  ;;  %v1470_v5 = vpop.permute.xlu1 %1469  ;;  %2263 = vset.pattern.permute.xlu1 %v2295_v26 }
 0x1cd   : > { %v1476_v10 = vsel %vm1475_vm13, %v1468_v6, %v1470_v5  ;;  %2264 = vset.pattern.permute.xlu0 %v2295_v26  ;;  %1972 = vperm.xlu1 %2263, %v1969_v25  }
 0x1ce   : > { %2163 = vmatmul.mubr.msk.f32.vlgmr.msra.gmra.mrb[2].mxu1 %vm495_vm8, %v2072_v31 }
 0x1cf   : > { %2166 = vmatpush3.msk.msra.mxu1 %vm499_vm7, %v2364_v7  ;;  %2167 = vmatprep.mubr.msk.f32.mxu1 %vm2286_vm1, %v2285_v2 }
 0x1d0   : > { %2170 = vmatprep.subr.mxu1 %v2285_v2  ;;  %v1472_v7 = vpop.permute.xlu1 %1471 }
 0x1d1   : > { %v1477_v11 = vsel %vm1475_vm13, %v1470_v5, %v1472_v7 }
 0x1d2   : > { %2108 = vmatprep.subr.msk.mxu0 %vm499_vm7, %v1477_v11 }
 0x1d3   : > { %2109 = vmatpush1.msk.msra.mxu0 %vm499_vm7, %v1476_v10 }
 0x1d4   : > { %v1474_v16 = vpop.permute.xlu1 %1473  ;;  %2110 = vmatmul.mubr.msk.f32.vlgmr.msra.gmra.mrb[2].mxu0 %vm495_vm8, %v2107_v17 }
 0x1d5   : > { %v1478_v18 = vsel %vm1475_vm13, %v1472_v7, %v1474_v16  ;;  %1719 = vmatprep.mubr.f32.mxu0 %v2285_v2 }
 0x1d6   : > { %2168 = vmatmul.mubr.msk.f32.vlgmr.msra.gmra.mrb[2].mxu1 %vm495_vm8, %v476_v41 }
 0x1d7   : > { %2171 = vmatpush3.msk.msra.mxu1 %vm499_vm7, %v810_v42  ;;  %2172 = vmatprep.mubr.msk.f32.mxu1 %vm2286_vm1, %v2285_v2 }
 0x1d8   : > { %2175 = vmatprep.subr.mxu1 %v2285_v2  ;;  %v1639_v19 = vpop.permute.xlu1 %1638 }
 0x1dc   : > { %v1641_v20 = vpop.permute.xlu1 %1640 }
 0x1dd   : > { %v1645_v22 = vsel %vm1642_vm15, %v1639_v19, %v1641_v20 }
 0x1de   : > { %2173 = vmatmul.mubr.msk.f32.vlgmr.msra.gmra.mrb[2].mxu1 %vm495_vm8, %v2083_v46 }
 0x1df   : > { %2177 = vmatprep.mubr.msk.f32.mxu1 %vm2286_vm1, %v2285_v2  ;;  %2176 = vmatpush3.msk.msra.mxu1 %vm499_vm7, %v977_v51 }
 0x1e0   : > { %2180 = vmatprep.subr.mxu1 %v2285_v2 }
 0x1e6   : > { %2178 = vmatmul.mubr.msk.f32.vlgmr.msra.gmra.mrb[2].mxu1 %vm495_vm8, %v2089_v50 }
 0x1e7   : > { %2182 = vmatprep.mubr.msk.f32.mxu1 %vm2286_vm1, %v2285_v2  ;;  %2181 = vmatpush3.msk.msra.mxu1 %vm499_vm7, %v1144_v59 }
 0x1e8   : > { %2185 = vmatprep.subr.mxu1 %v2285_v2 }
 0x1ee   : > { %2183 = vmatmul.mubr.msk.f32.vlgmr.msra.gmra.mrb[2].mxu1 %vm495_vm8, %v2095_v56 }
 0x1ef   : > { %2187 = vmatprep.mubr.msk.f32.mxu1 %vm2286_vm1, %v2285_v2  ;;  %2186 = vmatpush3.msk.msra.mxu1 %vm499_vm7, %v1311_v4 }
 0x1f0   : > { %2190 = vmatprep.subr.mxu1 %v2285_v2 }
 0x1f6   : > { %2188 = vmatmul.mubr.msk.f32.vlgmr.msra.gmra.mrb[2].mxu1 %vm495_vm8, %v2101_v0 }
 0x1f7   : > { %2192 = vmatprep.mubr.msk.f32.mxu1 %vm2286_vm1, %v2285_v2  ;;  %2191 = vmatpush3.msk.msra.mxu1 %vm499_vm7, %v1478_v18 }
 0x1f8   : > { %2195 = vmatprep.subr.mxu1 %v2285_v2 }
 0x1fe   : > { %2193 = vmatmul.mubr.msk.f32.vlgmr.msra.gmra.mrb[2].mxu1 %vm495_vm8, %v2107_v17 }
 0x1ff   : > { %2197 = vmatprep.mubr.msk.f32.mxu1 %vm2286_vm1, %v2285_v2  ;;  %2196 = vmatpush3.msk.msra.mxu1 %vm499_vm7, %v1645_v22 }
 0x200   : > { %2200 = vmatprep.subr.mxu1 %v2285_v2 }
 0x206   : > { %2198 = vmatmul.mubr.msk.f32.vlgmr.msra.gmra.mrb[2].mxu1 %vm495_vm8, %v2113_v21 }
 0x207   : > { %2202 = vmatprep.mubr.msk.f32.mxu1 %vm2286_vm1, %v2285_v2 }
 0x29d   : > { %v2500_v12 = vpop.f32.mrb[0].mxu1 }
 0x29e   : > { %v2159_v13 = vpop.f32.mrb[1].mxu1  ;;  %v437_v14 = vmul.f32 %v2500_v12, %v2500_v12 }
 0x2a0   : > { %v439_v15 = vsel %vm438_vm14, %v437_v14, 0.0 }
 0x2a1   : > { %440 = vadd.xlane.f32.xlu0 %v439_v15 }
 0x2b7   : > { %1636 = vrot.lane.b32.xlu0 %v2371_v9, %s2293_s14 }
 0x2bb   : > { %1634 = vrot.lane.b32.xlu0 %v2366_v8, %s2293_s14 }
 0x2bf   : > { %1803 = vrot.lane.b32.xlu0 %v2371_v9, %s2294_s19  ;;  %v1806_v9 = vpop.permute.xlu1 %1805 }
 0x2c3   : > { %1801 = vrot.lane.b32.xlu0 %v2366_v8, %s2294_s19  ;;  %v1808_v8 = vpop.permute.xlu1 %1807  ;;  %s2237_s19 = smul.u32 24, %s2576_s22 }
 0x2c4   : > { %v1812_v24 = vsel %vm1809_vm0, %v1806_v9, %v1808_v8 }
 0x2c5   : > { %2201 = vmatpush3.msk.msra.mxu1 %vm499_vm7, %v1812_v24  ;;  %s257_s24 = scalar_lea.vmem %s2573_s5, %s2237_s19 }
 0x2c6   : > { %2203 = vmatmul.mubr.msk.f32.vlgmr.msra.gmra.mrb[2].mxu1 %vm495_vm8, %v2119_v23 }
 0x2c7   : > { %v1973_v1 = vpop.permute.xlu1 %1972 }
 0x32e   : > { %v441_v27 = vpop.xlane.xlu0 %440 }
 0x32f   : > { %v442_v28 = vrot.slane %v441_v27, 4 }
 0x331   : > { %v443_v29 = vadd.f32 %v442_v28, %v441_v27 }
 0x332   : > { %v1637_v30 = vpop.permute.xlu0 %1636 }
 0x333   : > { %v444_v31 = vrot.slane %v443_v29, 2  ;;  %v1644_v32 = vsel %vm1642_vm15, %v1637_v30, %v1639_v19 }
 0x334   : > { %2114 = vmatprep.subr.msk.mxu0 %vm499_vm7, %v1644_v32 }
 0x335   : > { %v445_v33 = vadd.f32 %v444_v31, %v443_v29 }
 0x336   : > { %v1635_v34 = vpop.permute.xlu0 %1634 }
 0x337   : > { %v446_v35 = vrot.slane %v445_v33, 1  ;;  %v1643_v36 = vsel %vm1642_vm15, %v1635_v34, %v1637_v30 }
 0x338   : > { %2115 = vmatpush1.msk.msra.mxu0 %vm499_vm7, %v1643_v36 }
 0x339   : > { %v447_v37 = vadd.f32 %v446_v35, %v445_v33  ;;  %2116 = vmatmul.mubr.msk.f32.vlgmr.msra.gmra.mrb[2].mxu0 %vm495_vm8, %v2113_v21 }
 0x33a   : > { %v1804_v38 = vpop.permute.xlu0 %1803  ;;  %1886 = vmatprep.mubr.f32.mxu0 %v2285_v2 }
 0x33b   : > { %2240 = vpush %v447_v37  ;;  %v1811_v39 = vsel %vm1809_vm0, %v1804_v38, %v1806_v9 }
 0x33c   : > { %2120 = vmatprep.subr.msk.mxu0 %vm499_vm7, %v1811_v39 }
 0x33e   : > { %v1802_v40 = vpop.permute.xlu0 %1801 }
 0x33f   : > { %v1810_v41 = vsel %vm1809_vm0, %v1802_v40, %v1804_v38 }
 0x340   : > { %2121 = vmatpush1.msk.msra.mxu0 %vm499_vm7, %v1810_v41 }
 0x341   : > { %2122 = vmatmul.mubr.msk.f32.vlgmr.msra.gmra.mrb[2].mxu0 %vm495_vm8, %v2119_v23 }
 0x36c   : > { %s2241_s14 = spop %2240 }
 0x36d   : > { %v449_v42 = vstv %s2241_s14 }
 0x36e   : > { %2271 = vrsqrt.f32 %v449_v42  ;;  %vm452_vm1 = vcmp.eq.f32.partialorder %v449_v42, inf  ;;  %v455_v2 = vand.u32 2147483648, %v449_v42  ;;  %vm454_vm2 = vcmp.eq.f32.partialorder %v449_v42, 0.0 }
 0x378   : > { %v2272_v43 = vpop.eup %2271 }
 0x379   : > { %v451_v44 = vmul.f32 %v2272_v43, %v449_v42 }
 0x37b   : > { %v453_v45 = vsel %vm452_vm1, %v449_v42, %v451_v44 }
 0x37c   : > { %v456_v46 = vsel %vm454_vm2, %v455_v2, %v453_v45 }
 0x37d   : > { %v457_v47 = vadd.f32 1e-12, %v456_v46 }
 0x37f   : > { %2273 = vrcp.f32 %v457_v47 }
 0x389   : > { %v2274_v48 = vpop.eup %2273 }
 0x38a   : > { %v459_v49 = vmul.f32 %v2274_v48, %v2500_v12 }
 0x38c   : > { %v460_v50 = vmul.f32 %v459_v49, %v2500_v12  ;;  %473 = vst.msk [vmem:[%s260_s17] sm:$0x1] %vm438_vm14, %v459_v49 }
 0x38e   : > { %v461_v51 = vsel %vm438_vm14, %v460_v50, 0.0 }
 0x38f   : > { %462 = vadd.xlane.f32.xlu0 %v461_v51 }
 0x399   : > { %v1959_v52 = vpop.f32.mrb[2].mxu1 }
 0x39a   : > { %v2204_v53 = vpop.f32.mrb[3].mxu1 }
 0x414   : > { %v1888_v54 = vpop.f32.mrb[2].mxu0 }
 0x415   : > { %v1890_v55 = vpop.f32.mrb[3].mxu0 }
 0x41c   : > { %v463_v56 = vpop.xlane.xlu0 %462 }
 0x41d   : > { %v464_v57 = vrot.slane %v463_v56, 4 }
 0x41f   : > { %v465_v58 = vadd.f32 %v464_v57, %v463_v56 }
 0x421   : > { %v466_v59 = vrot.slane %v465_v58, 2 }
 0x423   : > { %v467_v60 = vadd.f32 %v466_v59, %v465_v58 }
 0x425   : > { %v468_v61 = vrot.slane %v467_v60, 1 }
 0x427   : > { %v469_v62 = vadd.f32 %v468_v61, %v467_v60 }
 0x429   : > { %2242 = vpush %v469_v62 }
 0x45a   : > { %s2243_s18 = spop %2242 }
 0x45b   : > { %v471_v63 = vstv %s2243_s18 }
 0x45c   : > { %2275 = vrcp.f32 %v471_v63 }
 0x466   : > { %v2276_v0 = vpop.eup %2275 }
 0x467   : > { %v1966_v3 = vmul.f32 %v2276_v0, %v1888_v54  ;;  %v1967_v4 = vmul.f32 %v2276_v0, %v1890_v55  ;;  %v1968_v5 = vmul.f32 %v2276_v0, %v1959_v52 }
 0x469   : > { %v1975_v6 = vadd.f32 %v1973_v1, %v1966_v3  ;;  %v1976_v7 = vadd.f32 %v1973_v1, %v1967_v4  ;;  %v1977_v10 = vadd.f32 %v1973_v1, %v1968_v5 }
 0x46b   : > { %1978 = vst [vmem:[%s257_s24] sm:$0xff] %v1975_v6  ;;  %1979 = vst [vmem:[%s257_s24 + $0x8] sm:$0xff] %v1976_v7 }
 0x46c   : > { %1980 = vst [vmem:[%s257_s24 + $0x10] sm:$0xff] %v1977_v10 }
 0x46d PF: > { %s17_s21 = sadd.s32 1, %s2283_s21  }
 0x46e   : > { %p14_p4 = scmp.ge.s32.totalorder %s17_s21, 4  }
 0x470   :  { %16 = sbr.rel (!%p14_p4) target bundleno = 1 (0x1), region = 90 }

</bundles_post_ra>
